<compile_context>
chip_gen: v7x
topology: tpu7x:2x2x1
jax: 0.10.0
libtpu: 0.0.40
codegen_flags: <defaults>
</compile_context>

<pallas_src>
import functools

import jax
import jax.numpy as jnp
import numpy as np
from jax import lax
from jax.experimental import pallas as pl
from jax.experimental.pallas import tpu as pltpu

BN_EPS = 1e-5


def _round_up(x, m):
    return (x + m - 1) // m * m


# --------------------------------- kernels ---------------------------------
def _conv_stats_kernel(taps_ref, w_ref, gamma_ref, beta_ref,
                       conv_ref, scale_ref, shift_ref,
                       sum_sc, sq_sc, *, inv_m):
    """Tiled conv matmul + streaming BatchNorm batch statistics.

    taps_ref : (Kp, TM)     bf16  folded im2col tile (K = 9*Cin, lane-dense M)
    w_ref    : (Coutp, Kp)  bf16  folded conv weight
    gamma/beta_ref : (Coutp, 1) f32  BN affine parameters
    conv_ref : (Coutp, TM)  f32   raw conv output tile
    scale/shift_ref: (Coutp, 1) f32  BN scale/shift (written on last grid step)
    sum_sc, sq_sc : (Coutp, 1) f32  per-channel streaming sum / sum-of-squares
    """
    i = pl.program_id(0)

    @pl.when(i == 0)
    def _():
        sum_sc[...] = jnp.zeros_like(sum_sc)
        sq_sc[...] = jnp.zeros_like(sq_sc)

    # Single MXU matmul: the 9 kernel taps are folded into the contraction dim.
    acc = jnp.dot(w_ref[...], taps_ref[...], preferred_element_type=jnp.float32)
    conv_ref[...] = acc

    # Streaming BN batch statistics (single pass over the conv output).
    # Note: sum/sumsq in f32; for extremely large M a Welford-style per-tile
    # mean/M2 combine would be numerically safer.
    sum_sc[...] += jnp.sum(acc, axis=1, keepdims=True)
    sq_sc[...] += jnp.sum(acc * acc, axis=1, keepdims=True)

    @pl.when(i == pl.num_programs(0) - 1)
    def _():
        mean = sum_sc[...] * inv_m
        var = jnp.maximum(sq_sc[...] * inv_m - mean * mean, 0.0)  # biased variance
        inv_std = lax.rsqrt(var + BN_EPS)
        scale = gamma_ref[...] * inv_std
        scale_ref[...] = scale
        shift_ref[...] = beta_ref[...] - mean * scale


def _bn_relu_kernel(conv_ref, scale_ref, shift_ref, o_ref):
    """Apply the finalized per-channel BN scale/shift + ReLU, store bf16."""
    o_ref[...] = jnp.maximum(
        conv_ref[...] * scale_ref[...] + shift_ref[...], 0.0
    ).astype(o_ref.dtype)


# ------------------------------ JAX-side glue -------------------------------
def _im2col_cm(x_cnhw, stride):
    """Pad (pad=1) and fold the 9 taps into (9*Cin, M), M = N*Ho*Wo on lanes."""
    c, n, h, w = x_cnhw.shape
    ho = (h + 2 - 3) // stride + 1
    wo = (w + 2 - 3) // stride + 1
    xp = jnp.pad(x_cnhw, ((0, 0), (0, 0), (1, 1), (1, 1)))
    taps = []
    for ky in range(3):
        for kx in range(3):
            t = lax.slice(
                xp,
                (0, 0, ky, kx),
                (c, n, ky + stride * (ho - 1) + 1, kx + stride * (wo - 1) + 1),
                (1, 1, stride, stride),
            )  # (Cin, N, Ho, Wo)
            taps.append(t.reshape(c, n * ho * wo))
    # Contraction ordering (ci, ky, kx) matches OIHW weight.reshape(Cout, Cin*9).
    taps = jnp.stack(taps, axis=1).reshape(c * 9, n * ho * wo)
    return taps, (n, ho, wo)


def conv3x3_bn_relu(x_cnhw, w_oihw, gamma, beta, *, stride, tile_m=512):
    """One conv3x3(pad=1, bias=False) + BN(train-mode batch stats) + ReLU stage.

    x_cnhw: (Cin, N, H, W) bf16 activation.  Returns (Cout, N, Ho, Wo) bf16.
    """
    cin = x_cnhw.shape[0]
    cout = w_oihw.shape[0]

    taps, (n, ho, wo) = _im2col_cm(x_cnhw, stride)          # (9*Cin, M)
    m = n * ho * wo
    k = 9 * cin

    kp = _round_up(k, 8)
    coutp = _round_up(cout, 8)
    tm = min(tile_m, _round_up(m, 128))                     # lane-dense M tile
    mp = _round_up(m, tm)
    n_tiles = mp // tm

    taps = jnp.pad(taps, ((0, kp - k), (0, mp - m))).astype(jnp.bfloat16)
    w2d = jnp.pad(w_oihw.reshape(cout, k),
                  ((0, coutp - cout), (0, kp - k))).astype(jnp.bfloat16)
    g = jnp.pad(gamma.astype(jnp.float32), (0, coutp - cout),
                constant_values=1.0).reshape(coutp, 1)
    b = jnp.pad(beta.astype(jnp.float32), (0, coutp - cout)).reshape(coutp, 1)

    # ---- pass 1: conv matmul + streaming BN stats -----------------------------
    conv_cost = pl.CostEstimate(
        flops=2 * coutp * kp * mp + 6 * coutp * mp,
        transcendentals=coutp,
        bytes_accessed=taps.size * 2 + w2d.size * 2 + coutp * mp * 4 + 4 * coutp * 4,
    )
    conv, scale, shift = pl.pallas_call(
        functools.partial(_conv_stats_kernel, inv_m=1.0 / m),
        out_shape=(
            jax.ShapeDtypeStruct((coutp, mp), jnp.float32),
            jax.ShapeDtypeStruct((coutp, 1), jnp.float32),
            jax.ShapeDtypeStruct((coutp, 1), jnp.float32),
        ),
        grid_spec=pltpu.PrefetchScalarGridSpec(
            num_scalar_prefetch=0,
            grid=(n_tiles,),
            in_specs=[
                pl.BlockSpec((kp, tm), lambda i: (0, i)),        # taps tile
                pl.BlockSpec((coutp, kp), lambda i: (0, 0)),     # weights
                pl.BlockSpec((coutp, 1), lambda i: (0, 0)),      # gamma
                pl.BlockSpec((coutp, 1), lambda i: (0, 0)),      # beta
            ],
            out_specs=[
                pl.BlockSpec((coutp, tm), lambda i: (0, i)),     # conv out
                pl.BlockSpec((coutp, 1), lambda i: (0, 0)),      # BN scale
                pl.BlockSpec((coutp, 1), lambda i: (0, 0)),      # BN shift
            ],
            scratch_shapes=[
                pltpu.VMEM((coutp, 1), jnp.float32),             # sum
                pltpu.VMEM((coutp, 1), jnp.float32),             # sum of squares
            ],
        ),
        compiler_params=pltpu.CompilerParams(
            # stats accumulate sequentially across M tiles -> "arbitrary"
            dimension_semantics=("arbitrary",),
            vmem_limit_bytes=64 * 1024 * 1024,
        ),
        cost_estimate=conv_cost,
    )(taps, w2d, g, b)

    # ---- pass 2: normalize + ReLU (elementwise, megacore-parallel safe) -------
    bn_cost = pl.CostEstimate(
        flops=3 * coutp * mp,
        transcendentals=0,
        bytes_accessed=coutp * mp * 4 + coutp * mp * 2 + 2 * coutp * 4,
    )
    act = pl.pallas_call(
        _bn_relu_kernel,
        out_shape=jax.ShapeDtypeStruct((coutp, mp), jnp.bfloat16),
        grid_spec=pltpu.PrefetchScalarGridSpec(
            num_scalar_prefetch=0,
            grid=(n_tiles,),
            in_specs=[
                pl.BlockSpec((coutp, tm), lambda i: (0, i)),
                pl.BlockSpec((coutp, 1), lambda i: (0, 0)),
                pl.BlockSpec((coutp, 1), lambda i: (0, 0)),
            ],
            out_specs=pl.BlockSpec((coutp, tm), lambda i: (0, i)),
        ),
        compiler_params=pltpu.CompilerParams(
            dimension_semantics=("parallel",),
            vmem_limit_bytes=64 * 1024 * 1024,
        ),
        cost_estimate=bn_cost,
    )(conv, scale, shift)

    return act[:cout, :m].reshape(cout, n, ho, wo)           # CNHW


def basic_block_forward(x_nchw, params):
    """Forward pass of BasicBlock. Accepts and returns NCHW (like PyTorch)."""
    x = jnp.transpose(x_nchw, (1, 0, 2, 3)).astype(jnp.bfloat16)   # -> CNHW bf16
    x = conv3x3_bn_relu(x, params["w1"], params["g1"], params["b1"], stride=2)
    x = conv3x3_bn_relu(x, params["w2"], params["g2"], params["b2"], stride=1)
    x = conv3x3_bn_relu(x, params["w3"], params["g3"], params["b3"], stride=1)
    return jnp.transpose(x, (1, 0, 2, 3)).astype(jnp.float32)      # -> NCHW f32


# ----------------------------- reference (pure JAX) -----------------------------
def _ref_stage(x_nchw, w_oihw, gamma, beta, *, stride):
    # Same precision policy as the kernel: bf16 conv operands, f32 accumulation,
    # f32 BN math, bf16 inter-stage activation.
    y = lax.conv_general_dilated(
        x_nchw.astype(jnp.bfloat16), w_oihw.astype(jnp.bfloat16),
        window_strides=(stride, stride), padding=((1, 1), (1, 1)),
        dimension_numbers=("NCHW", "OIHW", "NCHW"),
        preferred_element_type=jnp.float32,
    )
    mean = jnp.mean(y, axis=(0, 2, 3), keepdims=True)
    var = jnp.mean(jnp.square(y - mean), axis=(0, 2, 3), keepdims=True)
    y = (y - mean) * lax.rsqrt(var + BN_EPS) * gamma.reshape(1, -1, 1, 1) \
        + beta.reshape(1, -1, 1, 1)
    return jnp.maximum(y, 0.0).astype(jnp.bfloat16)


def basic_block_reference(x_nchw, params):
    x = x_nchw.astype(jnp.bfloat16)
    x = _ref_stage(x, params["w1"], params["g1"], params["b1"], stride=2)
    x = _ref_stage(x, params["w2"], params["g2"], params["b2"], stride=1)
    x = _ref_stage(x, params["w3"], params["g3"], params["b3"], stride=1)
    return x.astype(jnp.float32)


if __name__ == "__main__":
    in_planes, out_planes = 4, 8
    batch, height, width = 2, 16, 16

    key = jax.random.PRNGKey(0)
    ks = jax.random.split(key, 10)

    # Deterministic synthetic parameters (conv weights in PyTorch OIHW layout).
    params = {
        "w1": 0.2 * jax.random.normal(ks[0], (out_planes, in_planes, 3, 3), jnp.float32),
        "g1": 1.0 + 0.1 * jax.random.normal(ks[1], (out_planes,), jnp.float32),
        "b1": 0.1 * jax.random.normal(ks[2], (out_planes,), jnp.float32),
        "w2": 0.2 * jax.random.normal(ks[3], (out_planes, out_planes, 3, 3), jnp.float32),
        "g2": 1.0 + 0.1 * jax.random.normal(ks[4], (out_planes,), jnp.float32),
        "b2": 0.1 * jax.random.normal(ks[5], (out_planes,), jnp.float32),
        "w3": 0.2 * jax.random.normal(ks[6], (out_planes, out_planes, 3, 3), jnp.float32),
        "g3": 1.0 + 0.1 * jax.random.normal(ks[7], (out_planes,), jnp.float32),
        "b3": 0.1 * jax.random.normal(ks[8], (out_planes,), jnp.float32),
    }

    x = jax.random.normal(ks[9], (batch, in_planes, height, width), jnp.float32)  # NCHW

    y = jax.block_until_ready(jax.jit(basic_block_forward)(x, params))
    assert y.shape == (batch, out_planes, height // 2, width // 2), y.shape

    y_ref = jax.block_until_ready(jax.jit(basic_block_reference)(x, params))
    np.testing.assert_allclose(np.asarray(y), np.asarray(y_ref), rtol=2e-2, atol=2e-2)

    print("KERNEL_OK")
</pallas_src>

<mosaic_0001>
module attributes {stable_mosaic.version = 11 : i64} {
  func.func @_bn_relu_kernel(%arg0: i32, %arg1: memref<8x128xf32, #tpu.memory_space<vmem>>, %arg2: memref<8x1xf32, #tpu.memory_space<vmem>>, %arg3: memref<8x1xf32, #tpu.memory_space<vmem>>, %arg4: memref<8x128xbf16, #tpu.memory_space<vmem>>) attributes {dimension_semantics = [#tpu.dimension_semantics<parallel>], iteration_bounds = array<i64: 1>, scalar_prefetch = 0 : i64, scratch_operands = 0 : i64, tpu.core_type = #tpu.core_type<tc>, window_params = [{transform_indices = @transform_0, window_bounds = array<i64: 8, 128>}, {pipeline_mode = #tpu.pipeline_mode<synchronous>, transform_indices = @transform_1, window_bounds = array<i64: 8, 1>}, {pipeline_mode = #tpu.pipeline_mode<synchronous>, transform_indices = @transform_2, window_bounds = array<i64: 8, 1>}, {transform_indices = @transform_3, window_bounds = array<i64: 8, 128>}]} {
    %c0 = arith.constant 0 : index
    %c0_0 = arith.constant 0 : index
    %0 = vector.load %arg1[%c0, %c0_0] : memref<8x128xf32, #tpu.memory_space<vmem>>, vector<8x128xf32>
    %c0_1 = arith.constant 0 : index
    %c0_2 = arith.constant 0 : index
    %1 = vector.load %arg2[%c0_1, %c0_2] : memref<8x1xf32, #tpu.memory_space<vmem>>, vector<8x1xf32>
    %2 = vector.broadcast %1 : vector<8x1xf32> to vector<8x128xf32>
    %3 = arith.mulf %0, %2 : vector<8x128xf32>
    %c0_3 = arith.constant 0 : index
    %c0_4 = arith.constant 0 : index
    %4 = vector.load %arg3[%c0_3, %c0_4] : memref<8x1xf32, #tpu.memory_space<vmem>>, vector<8x1xf32>
    %5 = vector.broadcast %4 : vector<8x1xf32> to vector<8x128xf32>
    %6 = arith.addf %3, %5 : vector<8x128xf32>
    %cst = arith.constant 0.000000e+00 : f32
    %7 = vector.broadcast %cst : f32 to vector<8x128xf32>
    %8 = arith.maximumf %6, %7 : vector<8x128xf32>
    %9 = arith.truncf %8 : vector<8x128xf32> to vector<8x128xbf16>
    %c0_5 = arith.constant 0 : index
    %c0_6 = arith.constant 0 : index
    %10 = vector.load %arg4[%c0_5, %c0_6] : memref<8x128xbf16, #tpu.memory_space<vmem>>, vector<8x128xbf16>
    tpu.vector_store %arg4[%c0_5, %c0_6], %9 {strides = array<i32>} : memref<8x128xbf16, #tpu.memory_space<vmem>>, vector<8x128xbf16>,
    return
  }
  func.func @transform_0(%arg0: i32) -> (i32, i32) {
    %c0_i32 = arith.constant 0 : i32
    %c0_i32_0 = arith.constant 0 : i32
    return %c0_i32, %arg0 : i32, i32
  }
  func.func @transform_1(%arg0: i32) -> (i32, i32) {
    %c0_i32 = arith.constant 0 : i32
    %c0_i32_0 = arith.constant 0 : i32
    %c0_i32_1 = arith.constant 0 : i32
    return %c0_i32, %c0_i32_0 : i32, i32
  }
  func.func @transform_2(%arg0: i32) -> (i32, i32) {
    %c0_i32 = arith.constant 0 : i32
    %c0_i32_0 = arith.constant 0 : i32
    %c0_i32_1 = arith.constant 0 : i32
    return %c0_i32, %c0_i32_0 : i32, i32
  }
  func.func @transform_3(%arg0: i32) -> (i32, i32) {
    %c0_i32 = arith.constant 0 : i32
    %c0_i32_0 = arith.constant 0 : i32
    return %c0_i32, %arg0 : i32, i32
  }
}

module attributes {stable_mosaic.version = 11 : i64} {
  func.func @_conv_stats_kernel(%arg0: i32, %arg1: memref<40x128xbf16, #tpu.memory_space<vmem>>, %arg2: memref<8x40xbf16, #tpu.memory_space<vmem>>, %arg3: memref<8x1xf32, #tpu.memory_space<vmem>>, %arg4: memref<8x1xf32, #tpu.memory_space<vmem>>, %arg5: memref<8x128xf32, #tpu.memory_space<vmem>>, %arg6: memref<8x1xf32, #tpu.memory_space<vmem>>, %arg7: memref<8x1xf32, #tpu.memory_space<vmem>>, %arg8: memref<8x1xf32, #tpu.memory_space<vmem>>, %arg9: memref<8x1xf32, #tpu.memory_space<vmem>>) attributes {dimension_semantics = [#tpu.dimension_semantics<arbitrary>], iteration_bounds = array<i64: 1>, scalar_prefetch = 0 : i64, scratch_operands = 2 : i64, tpu.core_type = #tpu.core_type<tc>, window_params = [{transform_indices = @transform_0, window_bounds = array<i64: 40, 128>}, {pipeline_mode = #tpu.pipeline_mode<synchronous>, transform_indices = @transform_1, window_bounds = array<i64: 8, 40>}, {pipeline_mode = #tpu.pipeline_mode<synchronous>, transform_indices = @transform_2, window_bounds = array<i64: 8, 1>}, {pipeline_mode = #tpu.pipeline_mode<synchronous>, transform_indices = @transform_3, window_bounds = array<i64: 8, 1>}, {transform_indices = @transform_4, window_bounds = array<i64: 8, 128>}, {pipeline_mode = #tpu.pipeline_mode<synchronous>, transform_indices = @transform_5, window_bounds = array<i64: 8, 1>}, {pipeline_mode = #tpu.pipeline_mode<synchronous>, transform_indices = @transform_6, window_bounds = array<i64: 8, 1>}]} {
    %c0_i32 = arith.constant 0 : i32
    %0 = arith.cmpi eq, %arg0, %c0_i32 : i32
    %1 = arith.extui %0 : i1 to i32
    %c0_i32_0 = arith.constant 0 : i32
    %2 = arith.cmpi ne, %1, %c0_i32_0 : i32
    scf.if %2 {
      %cst_18 = arith.constant 0.000000e+00 : f32
      %21 = vector.broadcast %cst_18 : f32 to vector<8x1xf32>
      %c0_19 = arith.constant 0 : index
      %c0_20 = arith.constant 0 : index
      %22 = vector.load %arg8[%c0_19, %c0_20] : memref<8x1xf32, #tpu.memory_space<vmem>>, vector<8x1xf32>
      tpu.vector_store %arg8[%c0_19, %c0_20], %21 {strides = array<i32>} : memref<8x1xf32, #tpu.memory_space<vmem>>, vector<8x1xf32>,
      %cst_21 = arith.constant 0.000000e+00 : f32
      %23 = vector.broadcast %cst_21 : f32 to vector<8x1xf32>
      %c0_22 = arith.constant 0 : index
      %c0_23 = arith.constant 0 : index
      %24 = vector.load %arg9[%c0_22, %c0_23] : memref<8x1xf32, #tpu.memory_space<vmem>>, vector<8x1xf32>
      tpu.vector_store %arg9[%c0_22, %c0_23], %23 {strides = array<i32>} : memref<8x1xf32, #tpu.memory_space<vmem>>, vector<8x1xf32>,
    } else {
    }
    %c0 = arith.constant 0 : index
    %c0_1 = arith.constant 0 : index
    %3 = vector.load %arg2[%c0, %c0_1] : memref<8x40xbf16, #tpu.memory_space<vmem>>, vector<8x40xbf16>
    %c0_2 = arith.constant 0 : index
    %c0_3 = arith.constant 0 : index
    %4 = vector.load %arg1[%c0_2, %c0_3] : memref<40x128xbf16, #tpu.memory_space<vmem>>, vector<40x128xbf16>
    %cst = arith.constant dense<0.000000e+00> : vector<8x128xf32>
    %5 = tpu.matmul %3, %4, %cst {dimension_numbers = #tpu.dot_dimension_numbers<[1], [0], [0], [1], [0, 0, 1, 1], [], []>} : vector<8x40xbf16>, vector<40x128xbf16>, vector<8x128xf32> -> vector<8x128xf32>
    %c0_4 = arith.constant 0 : index
    %c0_5 = arith.constant 0 : index
    %6 = vector.load %arg5[%c0_4, %c0_5] : memref<8x128xf32, #tpu.memory_space<vmem>>, vector<8x128xf32>
    tpu.vector_store %arg5[%c0_4, %c0_5], %5 {strides = array<i32>} : memref<8x128xf32, #tpu.memory_space<vmem>>, vector<8x128xf32>,
    %c0_6 = arith.constant 0 : index
    %c0_7 = arith.constant 0 : index
    %7 = vector.load %arg8[%c0_6, %c0_7] : memref<8x1xf32, #tpu.memory_space<vmem>>, vector<8x1xf32>
    %cst_8 = arith.constant dense<0.000000e+00> : vector<8xf32>
    %8 = vector.multi_reduction <add>, %5, %cst_8 [1] : vector<8x128xf32> to vector<8xf32>
    %9 = vector.shape_cast %8 : vector<8xf32> to vector<8x1xf32>
    %10 = arith.addf %7, %9 : vector<8x1xf32>
    %c0_9 = arith.constant 0 : index
    %c0_10 = arith.constant 0 : index
    %11 = vector.load %arg8[%c0_9, %c0_10] : memref<8x1xf32, #tpu.memory_space<vmem>>, vector<8x1xf32>
    tpu.vector_store %arg8[%c0_9, %c0_10], %10 {strides = array<i32>} : memref<8x1xf32, #tpu.memory_space<vmem>>, vector<8x1xf32>,
    %c0_11 = arith.constant 0 : index
    %c0_12 = arith.constant 0 : index
    %12 = vector.load %arg9[%c0_11, %c0_12] : memref<8x1xf32, #tpu.memory_space<vmem>>, vector<8x1xf32>
    %13 = arith.mulf %5, %5 : vector<8x128xf32>
    %cst_13 = arith.constant dense<0.000000e+00> : vector<8xf32>
    %14 = vector.multi_reduction <add>, %13, %cst_13 [1] : vector<8x128xf32> to vector<8xf32>
    %15 = vector.shape_cast %14 : vector<8xf32> to vector<8x1xf32>
    %16 = arith.addf %12, %15 : vector<8x1xf32>
    %c0_14 = arith.constant 0 : index
    %c0_15 = arith.constant 0 : index
    %17 = vector.load %arg9[%c0_14, %c0_15] : memref<8x1xf32, #tpu.memory_space<vmem>>, vector<8x1xf32>
    tpu.vector_store %arg9[%c0_14, %c0_15], %16 {strides = array<i32>} : memref<8x1xf32, #tpu.memory_space<vmem>>, vector<8x1xf32>,
    %c0_i32_16 = arith.constant 0 : i32
    %18 = arith.cmpi eq, %arg0, %c0_i32_16 : i32
    %19 = arith.extui %18 : i1 to i32
    %c0_i32_17 = arith.constant 0 : i32
    %20 = arith.cmpi ne, %19, %c0_i32_17 : i32
    scf.if %20 {
      %c0_18 = arith.constant 0 : index
      %c0_19 = arith.constant 0 : index
      %21 = vector.load %arg8[%c0_18, %c0_19] : memref<8x1xf32, #tpu.memory_space<vmem>>, vector<8x1xf32>
      %cst_20 = arith.constant 7.812500e-03 : f32
      %22 = vector.broadcast %cst_20 : f32 to vector<8x1xf32>
      %23 = arith.mulf %21, %22 : vector<8x1xf32>
      %c0_21 = arith.constant 0 : index
      %c0_22 = arith.constant 0 : index
      %24 = vector.load %arg9[%c0_21, %c0_22] : memref<8x1xf32, #tpu.memory_space<vmem>>, vector<8x1xf32>
      %cst_23 = arith.constant 7.812500e-03 : f32
      %25 = vector.broadcast %cst_23 : f32 to vector<8x1xf32>
      %26 = arith.mulf %24, %25 : vector<8x1xf32>
      %27 = arith.mulf %23, %23 : vector<8x1xf32>
      %28 = arith.subf %26, %27 : vector<8x1xf32>
      %cst_24 = arith.constant 0.000000e+00 : f32
      %29 = vector.broadcast %cst_24 : f32 to vector<8x1xf32>
      %30 = arith.maximumf %28, %29 : vector<8x1xf32>
      %cst_25 = arith.constant 9.99999974E-6 : f32
      %31 = vector.broadcast %cst_25 : f32 to vector<8x1xf32>
      %32 = arith.addf %30, %31 : vector<8x1xf32>
      %33 = math.rsqrt %32 : vector<8x1xf32>
      %c0_26 = arith.constant 0 : index
      %c0_27 = arith.constant 0 : index
      %34 = vector.load %arg3[%c0_26, %c0_27] : memref<8x1xf32, #tpu.memory_space<vmem>>, vector<8x1xf32>
      %35 = arith.mulf %34, %33 : vector<8x1xf32>
      %c0_28 = arith.constant 0 : index
      %c0_29 = arith.constant 0 : index
      %36 = vector.load %arg6[%c0_28, %c0_29] : memref<8x1xf32, #tpu.memory_space<vmem>>, vector<8x1xf32>
      tpu.vector_store %arg6[%c0_28, %c0_29], %35 {strides = array<i32>} : memref<8x1xf32, #tpu.memory_space<vmem>>, vector<8x1xf32>,
      %c0_30 = arith.constant 0 : index
      %c0_31 = arith.constant 0 : index
      %37 = vector.load %arg4[%c0_30, %c0_31] : memref<8x1xf32, #tpu.memory_space<vmem>>, vector<8x1xf32>
      %38 = arith.mulf %23, %35 : vector<8x1xf32>
      %39 = arith.subf %37, %38 : vector<8x1xf32>
      %c0_32 = arith.constant 0 : index
      %c0_33 = arith.constant 0 : index
      %40 = vector.load %arg7[%c0_32, %c0_33] : memref<8x1xf32, #tpu.memory_space<vmem>>, vector<8x1xf32>
      tpu.vector_store %arg7[%c0_32, %c0_33], %39 {strides = array<i32>} : memref<8x1xf32, #tpu.memory_space<vmem>>, vector<8x1xf32>,
    } else {
    }
    return
  }
  func.func @transform_0(%arg0: i32) -> (i32, i32) {
    %c0_i32 = arith.constant 0 : i32
    %c0_i32_0 = arith.constant 0 : i32
    return %c0_i32, %arg0 : i32, i32
  }
  func.func @transform_1(%arg0: i32) -> (i32, i32) {
    %c0_i32 = arith.constant 0 : i32
    %c0_i32_0 = arith.constant 0 : i32
    %c0_i32_1 = arith.constant 0 : i32
    return %c0_i32, %c0_i32_0 : i32, i32
  }
  func.func @transform_2(%arg0: i32) -> (i32, i32) {
    %c0_i32 = arith.constant 0 : i32
    %c0_i32_0 = arith.constant 0 : i32
    %c0_i32_1 = arith.constant 0 : i32
    return %c0_i32, %c0_i32_0 : i32, i32
  }
  func.func @transform_3(%arg0: i32) -> (i32, i32) {
    %c0_i32 = arith.constant 0 : i32
    %c0_i32_0 = arith.constant 0 : i32
    %c0_i32_1 = arith.constant 0 : i32
    return %c0_i32, %c0_i32_0 : i32, i32
  }
  func.func @transform_4(%arg0: i32) -> (i32, i32) {
    %c0_i32 = arith.constant 0 : i32
    %c0_i32_0 = arith.constant 0 : i32
    return %c0_i32, %arg0 : i32, i32
  }
  func.func @transform_5(%arg0: i32) -> (i32, i32) {
    %c0_i32 = arith.constant 0 : i32
    %c0_i32_0 = arith.constant 0 : i32
    %c0_i32_1 = arith.constant 0 : i32
    return %c0_i32, %c0_i32_0 : i32, i32
  }
  func.func @transform_6(%arg0: i32) -> (i32, i32) {
    %c0_i32 = arith.constant 0 : i32
    %c0_i32_0 = arith.constant 0 : i32
    %c0_i32_1 = arith.constant 0 : i32
    return %c0_i32, %c0_i32_0 : i32, i32
  }
}

module attributes {stable_mosaic.version = 11 : i64} {
  func.func @_conv_stats_kernel(%arg0: i32, %arg1: memref<72x128xbf16, #tpu.memory_space<vmem>>, %arg2: memref<8x72xbf16, #tpu.memory_space<vmem>>, %arg3: memref<8x1xf32, #tpu.memory_space<vmem>>, %arg4: memref<8x1xf32, #tpu.memory_space<vmem>>, %arg5: memref<8x128xf32, #tpu.memory_space<vmem>>, %arg6: memref<8x1xf32, #tpu.memory_space<vmem>>, %arg7: memref<8x1xf32, #tpu.memory_space<vmem>>, %arg8: memref<8x1xf32, #tpu.memory_space<vmem>>, %arg9: memref<8x1xf32, #tpu.memory_space<vmem>>) attributes {dimension_semantics = [#tpu.dimension_semantics<arbitrary>], iteration_bounds = array<i64: 1>, scalar_prefetch = 0 : i64, scratch_operands = 2 : i64, tpu.core_type = #tpu.core_type<tc>, window_params = [{transform_indices = @transform_0, window_bounds = array<i64: 72, 128>}, {pipeline_mode = #tpu.pipeline_mode<synchronous>, transform_indices = @transform_1, window_bounds = array<i64: 8, 72>}, {pipeline_mode = #tpu.pipeline_mode<synchronous>, transform_indices = @transform_2, window_bounds = array<i64: 8, 1>}, {pipeline_mode = #tpu.pipeline_mode<synchronous>, transform_indices = @transform_3, window_bounds = array<i64: 8, 1>}, {transform_indices = @transform_4, window_bounds = array<i64: 8, 128>}, {pipeline_mode = #tpu.pipeline_mode<synchronous>, transform_indices = @transform_5, window_bounds = array<i64: 8, 1>}, {pipeline_mode = #tpu.pipeline_mode<synchronous>, transform_indices = @transform_6, window_bounds = array<i64: 8, 1>}]} {
    %c0_i32 = arith.constant 0 : i32
    %0 = arith.cmpi eq, %arg0, %c0_i32 : i32
    %1 = arith.extui %0 : i1 to i32
    %c0_i32_0 = arith.constant 0 : i32
    %2 = arith.cmpi ne, %1, %c0_i32_0 : i32
    scf.if %2 {
      %cst_18 = arith.constant 0.000000e+00 : f32
      %21 = vector.broadcast %cst_18 : f32 to vector<8x1xf32>
      %c0_19 = arith.constant 0 : index
      %c0_20 = arith.constant 0 : index
      %22 = vector.load %arg8[%c0_19, %c0_20] : memref<8x1xf32, #tpu.memory_space<vmem>>, vector<8x1xf32>
      tpu.vector_store %arg8[%c0_19, %c0_20], %21 {strides = array<i32>} : memref<8x1xf32, #tpu.memory_space<vmem>>, vector<8x1xf32>,
      %cst_21 = arith.constant 0.000000e+00 : f32
      %23 = vector.broadcast %cst_21 : f32 to vector<8x1xf32>
      %c0_22 = arith.constant 0 : index
      %c0_23 = arith.constant 0 : index
      %24 = vector.load %arg9[%c0_22, %c0_23] : memref<8x1xf32, #tpu.memory_space<vmem>>, vector<8x1xf32>
      tpu.vector_store %arg9[%c0_22, %c0_23], %23 {strides = array<i32>} : memref<8x1xf32, #tpu.memory_space<vmem>>, vector<8x1xf32>,
    } else {
    }
    %c0 = arith.constant 0 : index
    %c0_1 = arith.constant 0 : index
    %3 = vector.load %arg2[%c0, %c0_1] : memref<8x72xbf16, #tpu.memory_space<vmem>>, vector<8x72xbf16>
    %c0_2 = arith.constant 0 : index
    %c0_3 = arith.constant 0 : index
    %4 = vector.load %arg1[%c0_2, %c0_3] : memref<72x128xbf16, #tpu.memory_space<vmem>>, vector<72x128xbf16>
    %cst = arith.constant dense<0.000000e+00> : vector<8x128xf32>
    %5 = tpu.matmul %3, %4, %cst {dimension_numbers = #tpu.dot_dimension_numbers<[1], [0], [0], [1], [0, 0, 1, 1], [], []>} : vector<8x72xbf16>, vector<72x128xbf16>, vector<8x128xf32> -> vector<8x128xf32>
    %c0_4 = arith.constant 0 : index
    %c0_5 = arith.constant 0 : index
    %6 = vector.load %arg5[%c0_4, %c0_5] : memref<8x128xf32, #tpu.memory_space<vmem>>, vector<8x128xf32>
    tpu.vector_store %arg5[%c0_4, %c0_5], %5 {strides = array<i32>} : memref<8x128xf32, #tpu.memory_space<vmem>>, vector<8x128xf32>,
    %c0_6 = arith.constant 0 : index
    %c0_7 = arith.constant 0 : index
    %7 = vector.load %arg8[%c0_6, %c0_7] : memref<8x1xf32, #tpu.memory_space<vmem>>, vector<8x1xf32>
    %cst_8 = arith.constant dense<0.000000e+00> : vector<8xf32>
    %8 = vector.multi_reduction <add>, %5, %cst_8 [1] : vector<8x128xf32> to vector<8xf32>
    %9 = vector.shape_cast %8 : vector<8xf32> to vector<8x1xf32>
    %10 = arith.addf %7, %9 : vector<8x1xf32>
    %c0_9 = arith.constant 0 : index
    %c0_10 = arith.constant 0 : index
    %11 = vector.load %arg8[%c0_9, %c0_10] : memref<8x1xf32, #tpu.memory_space<vmem>>, vector<8x1xf32>
    tpu.vector_store %arg8[%c0_9, %c0_10], %10 {strides = array<i32>} : memref<8x1xf32, #tpu.memory_space<vmem>>, vector<8x1xf32>,
    %c0_11 = arith.constant 0 : index
    %c0_12 = arith.constant 0 : index
    %12 = vector.load %arg9[%c0_11, %c0_12] : memref<8x1xf32, #tpu.memory_space<vmem>>, vector<8x1xf32>
    %13 = arith.mulf %5, %5 : vector<8x128xf32>
    %cst_13 = arith.constant dense<0.000000e+00> : vector<8xf32>
    %14 = vector.multi_reduction <add>, %13, %cst_13 [1] : vector<8x128xf32> to vector<8xf32>
    %15 = vector.shape_cast %14 : vector<8xf32> to vector<8x1xf32>
    %16 = arith.addf %12, %15 : vector<8x1xf32>
    %c0_14 = arith.constant 0 : index
    %c0_15 = arith.constant 0 : index
    %17 = vector.load %arg9[%c0_14, %c0_15] : memref<8x1xf32, #tpu.memory_space<vmem>>, vector<8x1xf32>
    tpu.vector_store %arg9[%c0_14, %c0_15], %16 {strides = array<i32>} : memref<8x1xf32, #tpu.memory_space<vmem>>, vector<8x1xf32>,
    %c0_i32_16 = arith.constant 0 : i32
    %18 = arith.cmpi eq, %arg0, %c0_i32_16 : i32
    %19 = arith.extui %18 : i1 to i32
    %c0_i32_17 = arith.constant 0 : i32
    %20 = arith.cmpi ne, %19, %c0_i32_17 : i32
    scf.if %20 {
      %c0_18 = arith.constant 0 : index
      %c0_19 = arith.constant 0 : index
      %21 = vector.load %arg8[%c0_18, %c0_19] : memref<8x1xf32, #tpu.memory_space<vmem>>, vector<8x1xf32>
      %cst_20 = arith.constant 7.812500e-03 : f32
      %22 = vector.broadcast %cst_20 : f32 to vector<8x1xf32>
      %23 = arith.mulf %21, %22 : vector<8x1xf32>
      %c0_21 = arith.constant 0 : index
      %c0_22 = arith.constant 0 : index
      %24 = vector.load %arg9[%c0_21, %c0_22] : memref<8x1xf32, #tpu.memory_space<vmem>>, vector<8x1xf32>
      %cst_23 = arith.constant 7.812500e-03 : f32
      %25 = vector.broadcast %cst_23 : f32 to vector<8x1xf32>
      %26 = arith.mulf %24, %25 : vector<8x1xf32>
      %27 = arith.mulf %23, %23 : vector<8x1xf32>
      %28 = arith.subf %26, %27 : vector<8x1xf32>
      %cst_24 = arith.constant 0.000000e+00 : f32
      %29 = vector.broadcast %cst_24 : f32 to vector<8x1xf32>
      %30 = arith.maximumf %28, %29 : vector<8x1xf32>
      %cst_25 = arith.constant 9.99999974E-6 : f32
      %31 = vector.broadcast %cst_25 : f32 to vector<8x1xf32>
      %32 = arith.addf %30, %31 : vector<8x1xf32>
      %33 = math.rsqrt %32 : vector<8x1xf32>
      %c0_26 = arith.constant 0 : index
      %c0_27 = arith.constant 0 : index
      %34 = vector.load %arg3[%c0_26, %c0_27] : memref<8x1xf32, #tpu.memory_space<vmem>>, vector<8x1xf32>
      %35 = arith.mulf %34, %33 : vector<8x1xf32>
      %c0_28 = arith.constant 0 : index
      %c0_29 = arith.constant 0 : index
      %36 = vector.load %arg6[%c0_28, %c0_29] : memref<8x1xf32, #tpu.memory_space<vmem>>, vector<8x1xf32>
      tpu.vector_store %arg6[%c0_28, %c0_29], %35 {strides = array<i32>} : memref<8x1xf32, #tpu.memory_space<vmem>>, vector<8x1xf32>,
      %c0_30 = arith.constant 0 : index
      %c0_31 = arith.constant 0 : index
      %37 = vector.load %arg4[%c0_30, %c0_31] : memref<8x1xf32, #tpu.memory_space<vmem>>, vector<8x1xf32>
      %38 = arith.mulf %23, %35 : vector<8x1xf32>
      %39 = arith.subf %37, %38 : vector<8x1xf32>
      %c0_32 = arith.constant 0 : index
      %c0_33 = arith.constant 0 : index
      %40 = vector.load %arg7[%c0_32, %c0_33] : memref<8x1xf32, #tpu.memory_space<vmem>>, vector<8x1xf32>
      tpu.vector_store %arg7[%c0_32, %c0_33], %39 {strides = array<i32>} : memref<8x1xf32, #tpu.memory_space<vmem>>, vector<8x1xf32>,
    } else {
    }
    return
  }
  func.func @transform_0(%arg0: i32) -> (i32, i32) {
    %c0_i32 = arith.constant 0 : i32
    %c0_i32_0 = arith.constant 0 : i32
    return %c0_i32, %arg0 : i32, i32
  }
  func.func @transform_1(%arg0: i32) -> (i32, i32) {
    %c0_i32 = arith.constant 0 : i32
    %c0_i32_0 = arith.constant 0 : i32
    %c0_i32_1 = arith.constant 0 : i32
    return %c0_i32, %c0_i32_0 : i32, i32
  }
  func.func @transform_2(%arg0: i32) -> (i32, i32) {
    %c0_i32 = arith.constant 0 : i32
    %c0_i32_0 = arith.constant 0 : i32
    %c0_i32_1 = arith.constant 0 : i32
    return %c0_i32, %c0_i32_0 : i32, i32
  }
  func.func @transform_3(%arg0: i32) -> (i32, i32) {
    %c0_i32 = arith.constant 0 : i32
    %c0_i32_0 = arith.constant 0 : i32
    %c0_i32_1 = arith.constant 0 : i32
    return %c0_i32, %c0_i32_0 : i32, i32
  }
  func.func @transform_4(%arg0: i32) -> (i32, i32) {
    %c0_i32 = arith.constant 0 : i32
    %c0_i32_0 = arith.constant 0 : i32
    return %c0_i32, %arg0 : i32, i32
  }
  func.func @transform_5(%arg0: i32) -> (i32, i32) {
    %c0_i32 = arith.constant 0 : i32
    %c0_i32_0 = arith.constant 0 : i32
    %c0_i32_1 = arith.constant 0 : i32
    return %c0_i32, %c0_i32_0 : i32, i32
  }
  func.func @transform_6(%arg0: i32) -> (i32, i32) {
    %c0_i32 = arith.constant 0 : i32
    %c0_i32_0 = arith.constant 0 : i32
    %c0_i32_1 = arith.constant 0 : i32
    return %c0_i32, %c0_i32_0 : i32, i32
  }
}

</mosaic_0001>

<bundles_post_ra>
// kernel: basic_block_forward.7
= control target key start
LH: loop header
LB: loop body
LE: loop exit
PB: predicated region body
PF: predicated region fallthrough
CT: control target
= control target key end

     0   :  { %8 = vsyncpa [#allocation3], 0  ;;  %s257_s0 = inlined_call_operand.hbm [shape: f32[8,128], index: 0, kind: input, shape index: {}]   ;;  %s258_s1 = inlined_call_operand.hbm [shape: f32[8,1], index: 1, kind: input, shape index: {}]   ;;  %s259_s2 = inlined_call_operand.hbm [shape: f32[8,1], index: 2, kind: input, shape index: {}]   ;;  %s260_s3 = inlined_call_operand.hbm [shape: bf16[8,128], index: 3, kind: output, shape index: {}]  }
   0x1   :  { %9 = vsyncpa [#allocation6], 0 }
   0x2   :  { %10 = vsyncpa [#allocation4], 0  ;;  %s184_s12 = smov [#allocation5]   ;;  %s185_s14 = smov [#allocation2]  }
   0x3   :  { %s27_s13 = sshll.u32 %s184_s12, 4  ;;  %s17_s15 = sshll.u32 %s185_s14, 4  ;;  %s28_s13 = int_to_ptr.vmem [resolvable:$true] %s27_s13  ;;  %s18_s15 = int_to_ptr.vmem [resolvable:$true] %s17_s15 }
   0x4   :  { %s90_s18 = scalar_lea.hbm %s258_s1, 128 }
   0x5   :  { %p91_p0 = scmp.ne.s32.totalorder %s258_s1, %s90_s18  ;;  %p94_p1 = scmp.lt.u32.totalorder %s90_s18, %s258_s1 }
   0x7   :  { %p96_p2 = pnand %p94_p1, %p91_p0 }
   0x9   :  { %99 = shalt.err (!%p96_p2)
}
   0xa   :  { %s100_s23 = scalar_lea.vmem %s28_s13, 128  ;;  %p105_p4 = scmp.lt.s32.totalorder %s28_s13, %s28_s13 }
   0xb   :  { %p101_p3 = scmp.ne.s32.totalorder %s28_s13, %s100_s23  ;;  %p106_p5 = scmp.lt.s32.totalorder %s100_s23, %s100_s23 }
   0xd   :  { %p107_p6 = por %p106_p5, %p105_p4 }
   0xf   :  { %p108_p7 = pnand %p107_p6, %p101_p3 }
  0x11   :  { %111 = shalt.err (!%p108_p7)
}
  0x12   :  { %30 = dma.hbm_to_vmem [thread:$0]  %s258_s1, 128, %s28_s13, [#allocation6]  }
  0x13   :  { %s112_s28 = scalar_lea.hbm %s257_s0, 128 }
  0x14   :  { %p113_p8 = scmp.ne.s32.totalorder %s257_s0, %s112_s28  ;;  %p116_p9 = scmp.lt.u32.totalorder %s112_s28, %s257_s0 }
  0x16   :  { %p118_p10 = pnand %p116_p9, %p113_p8 }
  0x18   :  { %121 = shalt.err (!%p118_p10)
}
  0x19   :  { %s122_s6 = scalar_lea.vmem %s18_s15, 128  ;;  %p127_p12 = scmp.lt.s32.totalorder %s18_s15, %s18_s15 }
  0x1a   :  { %p123_p11 = scmp.ne.s32.totalorder %s18_s15, %s122_s6  ;;  %p128_p13 = scmp.lt.s32.totalorder %s122_s6, %s122_s6 }
  0x1c   :  { %p129_p0 = por %p128_p13, %p127_p12 }
  0x1e   :  { %p130_p1 = pnand %p129_p0, %p123_p11 }
  0x20   :  { %133 = shalt.err (!%p130_p1)
}
  0x21   :  { %20 = dma.hbm_to_vmem [thread:$0]  %s257_s0, 128, %s18_s15, [#allocation3]  }
  0x22   :  { %s186_s8 = smov [#allocation7]   ;;  %s134_s12 = scalar_lea.hbm %s259_s2, 128 }
  0x23   :  { %s37_s9 = sshll.u32 %s186_s8, 4  ;;  %p135_p2 = scmp.ne.s32.totalorder %s259_s2, %s134_s12  ;;  %s38_s9 = int_to_ptr.vmem [resolvable:$true] %s37_s9 }
  0x24   :  { %p138_p3 = scmp.lt.u32.totalorder %s134_s12, %s259_s2 }
  0x26   :  { %p140_p4 = pnand %p138_p3, %p135_p2 }
  0x28   :  { %143 = shalt.err (!%p140_p4)
}
  0x29   :  { %s144_s18 = scalar_lea.vmem %s38_s9, 128  ;;  %p149_p6 = scmp.lt.s32.totalorder %s38_s9, %s38_s9 }
  0x2a   :  { %p145_p5 = scmp.ne.s32.totalorder %s38_s9, %s144_s18  ;;  %p150_p7 = scmp.lt.s32.totalorder %s144_s18, %s144_s18 }
  0x2c   :  { %p151_p8 = por %p150_p7, %p149_p6 }
  0x2e   :  { %p152_p9 = pnand %p151_p8, %p145_p5 }
  0x30   :  { %155 = shalt.err (!%p152_p9)
}
  0x31   :  { %40 = dma.hbm_to_vmem [thread:$0]  %s259_s2, 128, %s38_s9, [#allocation6]  }
  0x32   :  { %178 = dma.done.wait [#allocation3], 128  }
  0x33   :  { %179 = vsyncadd [#allocation3], 4294967168 }
  0x34   :  { %180 = dma.done.wait [#allocation6], 256  }
  0x35   :  { %181 = vsyncadd [#allocation6], 4294967040  ;;  %v187_v0 = vmov 0   ;;  %v51_v1 = vld [vmem:[#allocation5] sm:$0xff]  ;;  %v58_v2 = vld [vmem:[#allocation7] sm:$0xff]  ;;  %s188_s19 = smov [#allocation8]  }
  0x36   :  { %89 = vset.pattern.permute.xlu0 %v187_v0  ;;  %v50_v4 = vld [vmem:[#allocation2] sm:$0xff]  ;;  %s74_s20 = sshll.u32 %s188_s19, 4  ;;  %s75_s20 = int_to_ptr.vmem [resolvable:$true] %s74_s20 }
  0x37   :  { %54 = vperm.xlu0 %89, %v51_v1   ;;  %s156_s2 = scalar_lea.vmem %s75_s20, 64  ;;  %p161_p11 = scmp.lt.s32.totalorder %s75_s20, %s75_s20 }
  0x38   :  { %p157_p10 = scmp.ne.s32.totalorder %s75_s20, %s156_s2  ;;  %p162_p12 = scmp.lt.s32.totalorder %s156_s2, %s156_s2 }
  0x3a   :  { %p163_p13 = por %p162_p12, %p161_p11 }
  0x3b   :  { %61 = vperm.xlu0 %89, %v58_v2  }
  0x3c   :  { %p164_p0 = pnand %p163_p13, %p157_p10 }
  0xb6   :  { %v55_v3 = vpop.permute.xlu0 %54 }
  0xb7   :  { %v57_v5 = vmul.f32 %v55_v3, %v50_v4 }
  0xba   :  { %v62_v6 = vpop.permute.xlu0 %61 }
  0xbb   :  { %v64_v7 = vadd.f32 %v62_v6, %v57_v5 }
  0xbd   :  { %v65_v8 = vmax.f32 %v64_v7, 0.0 }
  0xbf   :  { %v66_v9 = vpack.c.bf16 %v65_v8, %v65_v8 }
  0xc1   :  { %67 = vst [vmem:[#allocation8] sm:$0xf] %v66_v9 }
  0xc2   :  { %167 = shalt.err (!%p164_p0)
}
  0xc3   :  { %s168_s23 = scalar_lea.hbm %s260_s3, 64 }
  0xc4   :  { %p169_p1 = scmp.ne.s32.totalorder %s260_s3, %s168_s23  ;;  %p172_p2 = scmp.lt.u32.totalorder %s168_s23, %s260_s3 }
  0xc6   :  { %p174_p3 = pnand %p172_p2, %p169_p1 }
  0xc8   :  { %177 = shalt.err (!%p174_p3)
}
  0xc9   :  { %77 = dma.vmem_to_hbm [thread:$0]  %s75_s20, 64, %s260_s3, [#allocation4]  }
  0xca   :  { %182 = dma.done.wait [#allocation4], 64  }
  0xcb   :  { %183 = vsyncadd [#allocation4], 4294967232 }
  0xcc   :  { %81 = vsyncpa [#allocation3], 1 }
  0xcd   :  { %82 = vsyncpa [#allocation6], 1 }
  0xce   :  { %83 = vsyncpa [#allocation4], 1 }

// kernel: basic_block_forward.6
= control target key start
LH: loop header
LB: loop body
LE: loop exit
PB: predicated region body
PF: predicated region fallthrough
CT: control target
= control target key end

     0   :  { %12 = vsyncpa [#allocation5], 0  ;;  %s565_s0 = inlined_call_operand.hbm [shape: bf16[40,128], index: 0, kind: input, shape index: {}]   ;;  %s566_s1 = inlined_call_operand.hbm [shape: bf16[8,40], index: 1, kind: input, shape index: {}]   ;;  %s567_s2 = inlined_call_operand.hbm [shape: f32[8,1], index: 2, kind: input, shape index: {}]   ;;  %s568_s3 = inlined_call_operand.hbm [shape: f32[8,1], index: 3, kind: input, shape index: {}]   ;;  %s569_s4 = inlined_call_operand.hbm [shape: f32[8,128], index: 4, kind: output, shape index: {0}]   ;;  %s570_s5 = inlined_call_operand.hbm [shape: f32[8,1], index: 5, kind: output, shape index: {1}]   ;;  %s571_s6 = inlined_call_operand.hbm [shape: f32[8,1], index: 6, kind: output, shape index: {2}]  }
   0x1   :  { %13 = vsyncpa [#allocation8], 0 }
   0x2   :  { %14 = vsyncpa [#allocation11], 0 }
   0x3   :  { %15 = vsyncpa [#allocation6], 0 }
   0x4   :  { %16 = vsyncpa [#allocation14], 0  ;;  %s422_s21 = smov [#allocation7]   ;;  %s423_s23 = smov [#allocation4]  }
   0x5   :  { %s35_s22 = sshll.u32 %s422_s21, 4  ;;  %s22_s24 = sshll.u32 %s423_s23, 4  ;;  %s36_s22 = int_to_ptr.vmem [resolvable:$true] %s35_s22  ;;  %s468_s24 = int_to_ptr.vmem [resolvable:$true] %s22_s24 }
   0x6   :  { %s258_s27 = scalar_lea.hbm %s566_s1, 64 }
   0x7   :  { %p259_p0 = scmp.ne.s32.totalorder %s566_s1, %s258_s27  ;;  %p262_p1 = scmp.lt.u32.totalorder %s258_s27, %s566_s1 }
   0x9   :  { %p264_p2 = pnand %p262_p1, %p259_p0 }
   0xb   :  { %267 = shalt.err (!%p264_p2)
}
   0xc   :  { %s268_s8 = scalar_lea.vmem %s36_s22, 64  ;;  %p273_p4 = scmp.lt.s32.totalorder %s36_s22, %s36_s22 }
   0xd   :  { %p269_p3 = scmp.ne.s32.totalorder %s36_s22, %s268_s8  ;;  %p274_p5 = scmp.lt.s32.totalorder %s268_s8, %s268_s8 }
   0xf   :  { %p275_p6 = por %p274_p5, %p273_p4 }
  0x11   :  { %p276_p7 = pnand %p275_p6, %p269_p3 }
  0x13   :  { %279 = shalt.err (!%p276_p7)
}
  0x14   :  { %38 = dma.hbm_to_vmem [thread:$0]  %s566_s1, 64, %s36_s22, [#allocation8]  }
  0x15   :  { %s280_s13 = scalar_lea.hbm %s565_s0, 320 }
  0x16   :  { %p281_p8 = scmp.ne.s32.totalorder %s565_s0, %s280_s13  ;;  %p284_p9 = scmp.lt.u32.totalorder %s280_s13, %s565_s0 }
  0x18   :  { %p286_p10 = pnand %p284_p9, %p281_p8 }
  0x1a   :  { %289 = shalt.err (!%p286_p10)
}
  0x1b   :  { %s290_s18 = scalar_lea.vmem %s468_s24, 320  ;;  %p295_p12 = scmp.lt.s32.totalorder %s468_s24, %s468_s24 }
  0x1c   :  { %p291_p11 = scmp.ne.s32.totalorder %s468_s24, %s290_s18  ;;  %p296_p13 = scmp.lt.s32.totalorder %s290_s18, %s290_s18 }
  0x1e   :  { %p297_p0 = por %p296_p13, %p295_p12 }
  0x20   :  { %p298_p1 = pnand %p297_p0, %p291_p11 }
  0x22   :  { %301 = shalt.err (!%p298_p1)
}
  0x23   :  { %s424_s1 = smov 64   ;;  %s425_s19 = smov 4  }
  0x24   :  { %28 = dma.hbm_to_vmem [thread:$0]  %s565_s0, 320, %s468_s24, [#allocation5], %s424_s1, %s424_s1, %s425_s19  }
  0x25   :  { %s426_s22 = smov [#allocation9]   ;;  %s427_s25 = smov [#allocation10]  }
  0x26   :  { %s45_s23 = sshll.u32 %s426_s22, 4  ;;  %s55_s26 = sshll.u32 %s427_s25, 4  ;;  %s46_s23 = int_to_ptr.vmem [resolvable:$true] %s45_s23  ;;  %s56_s26 = int_to_ptr.vmem [resolvable:$true] %s55_s26 }
  0x27   :  { %s302_s29 = scalar_lea.hbm %s567_s2, 128 }
  0x28   :  { %p303_p2 = scmp.ne.s32.totalorder %s567_s2, %s302_s29  ;;  %p306_p3 = scmp.lt.u32.totalorder %s302_s29, %s567_s2 }
  0x2a   :  { %p308_p4 = pnand %p306_p3, %p303_p2 }
  0x2c   :  { %311 = shalt.err (!%p308_p4)
}
  0x2d   :  { %s312_s0 = scalar_lea.vmem %s46_s23, 128  ;;  %p317_p6 = scmp.lt.s32.totalorder %s46_s23, %s46_s23 }
  0x2e   :  { %p313_p5 = scmp.ne.s32.totalorder %s46_s23, %s312_s0  ;;  %p318_p7 = scmp.lt.s32.totalorder %s312_s0, %s312_s0 }
  0x30   :  { %p319_p8 = por %p318_p7, %p317_p6 }
  0x32   :  { %p320_p9 = pnand %p319_p8, %p313_p5 }
  0x34   :  { %323 = shalt.err (!%p320_p9)
}
  0x35   :  { %48 = dma.hbm_to_vmem [thread:$0]  %s567_s2, 128, %s46_s23, [#allocation8]  }
  0x36   :  { %s324_s13 = scalar_lea.hbm %s568_s3, 128 }
  0x37   :  { %p325_p10 = scmp.ne.s32.totalorder %s568_s3, %s324_s13  ;;  %p328_p11 = scmp.lt.u32.totalorder %s324_s13, %s568_s3 }
  0x39   :  { %p330_p12 = pnand %p328_p11, %p325_p10 }
  0x3b   :  { %333 = shalt.err (!%p330_p12)
}
  0x3c   :  { %s334_s18 = scalar_lea.vmem %s56_s26, 128  ;;  %p339_p0 = scmp.lt.s32.totalorder %s56_s26, %s56_s26 }
  0x3d   :  { %p335_p13 = scmp.ne.s32.totalorder %s56_s26, %s334_s18  ;;  %p340_p1 = scmp.lt.s32.totalorder %s334_s18, %s334_s18 }
  0x3f   :  { %p341_p2 = por %p340_p1, %p339_p0 }
  0x41   :  { %p342_p3 = pnand %p341_p2, %p335_p13 }
  0x43   :  { %345 = shalt.err (!%p342_p3)
}
  0x44   :  { %58 = dma.hbm_to_vmem [thread:$0]  %s568_s3, 128, %s56_s26, [#allocation11]  }
  0x45   :  { %412 = dma.done.wait [#allocation5], 320  }
  0x46   :  { %413 = vsyncadd [#allocation5], 4294966976 }
  0x47   :  { %414 = dma.done.wait [#allocation8], 192  }
  0x48   :  { %415 = vsyncadd [#allocation8], 4294967104 }
  0x49   :  { %416 = dma.done.wait [#allocation11], 128  }
  0x4a   :  { %417 = vsyncadd [#allocation11], 4294967168  ;;  %v428_v0 = vmov 0.0   ;;  %vm429_vm0 = vmmov 0   ;;  %v253_v1 = vld [vmem:[#allocation4] sm:$0xff]   ;;  %v254_v2 = vld [vmem:[#allocation4 + $0x8] sm:$0xff]  }
  0x4b   :  { %232 = vmatprep.subr.bf16.mxu0 %v428_v0  ;;  %238 = vmatprep.mubr.msk.bf16.mxu0 %vm429_vm0, %v428_v0  ;;  %v255_v3 = vld [vmem:[#allocation4 + $0x10] ss:$0 sps:$4 sm:$0xff]   ;;  %vm104_vm1 = vcmask 1043456   ;;  %v79_v5 = vld [vmem:[#allocation7] sm:$0xf]  ;;  %vm100_vm2 = vcmask 326656  }
  0x4c   :  { %233 = vmatpush3.bf16.msra.mxu0 %v253_v1  ;;  %v106_v4 = vsel %vm104_vm1, %v255_v3, 0  ;;  %vm76_vm3 = vcmask 7168   ;;  %s430_s3 = smov [#allocation12]  }
  0x4d   :  { %234 = vmatprep.subr.bf16.mxu0 %v428_v0  ;;  %77 = vst.msk [vmem:[#allocation2] sm:$0xff] %vm76_vm3, %v428_v0  ;;  %78 = vst.msk [vmem:[#allocation3] sm:$0xff] %vm76_vm3, %v428_v0  ;;  %s186_s19 = sshll.u32 %s430_s3, 4  ;;  %s187_s19 = int_to_ptr.vmem [resolvable:$true] %s186_s19 }
  0x4e   :  { %s346_s20 = scalar_lea.vmem %s187_s19, 128  ;;  %p351_p5 = scmp.lt.s32.totalorder %s187_s19, %s187_s19 }
  0x4f   :  { %p347_p4 = scmp.ne.s32.totalorder %s187_s19, %s346_s20  ;;  %p352_p6 = scmp.lt.s32.totalorder %s346_s20, %s346_s20 }
  0x50   :  { %235 = vmatpush3.bf16.msra.mxu0 %v254_v2 }
  0x51   :  { %236 = vmatprep.subr.bf16.mxu0 %v428_v0  ;;  %p353_p7 = por %p352_p6, %p351_p5 }
  0x53   :  { %p354_p8 = pnand %p353_p7, %p347_p4 }
  0x54   :  { %237 = vmatpush3.bf16.msra.mxu0 %v106_v4 }
  0x57   :  { %239 = vmatmul.mubr.msk.bf16.vlgmr.msra.gmra.mrb[0].mxu0 %vm100_vm2, %v79_v5 }
 0x12a   :  { %v142_v6 = vpop.f32.mrb[0].mxu0 }
 0x12b   :  { %148 = vst [vmem:[#allocation12] sm:$0xff] %v142_v6  ;;  %150 = vadd.xlane.f32.xlu0 %v142_v6  ;;  %v240_v7 = vpop.f32.mrb[1].mxu0  ;;  %v156_v10 = vmul.f32 %v142_v6, %v142_v6 }
 0x12c   :  { %v145_v8 = vpop.f32.mrb[2].mxu0 }
 0x12d   :  { %v241_v9 = vpop.f32.mrb[3].mxu0 }
 0x12f   :  { %157 = vadd.xlane.f32.xlu0 %v156_v10 }
 0x130   :  { %357 = shalt.err (!%p354_p8)
}
 0x131   :  { %s358_s23 = scalar_lea.hbm %s569_s4, 128 }
 0x132   :  { %p359_p9 = scmp.ne.s32.totalorder %s569_s4, %s358_s23  ;;  %p362_p10 = scmp.lt.u32.totalorder %s358_s23, %s569_s4 }
 0x134   :  { %p364_p11 = pnand %p362_p10, %p359_p9 }
 0x136   :  { %367 = shalt.err (!%p364_p11)
}
 0x137   :  { %189 = dma.vmem_to_hbm [thread:$0]  %s187_s19, 128, %s569_s4, [#allocation6]   ;;  %v149_v11 = vld [vmem:[#allocation2] sm:$0xff]  ;;  %v155_v14 = vld [vmem:[#allocation3] sm:$0xff]  ;;  %v176_v28 = vld [vmem:[#allocation10] sm:$0xff] }
 0x138   :  { %v173_v25 = vld [vmem:[#allocation9] sm:$0xff]  ;;  %s431_s4 = smov [#allocation13]   ;;  %s432_s8 = smov [#allocation15]  }
 0x139   :  { %s196_s7 = sshll.u32 %s431_s4, 4  ;;  %s206_s9 = sshll.u32 %s432_s8, 4  ;;  %s197_s7 = int_to_ptr.vmem [resolvable:$true] %s196_s7  ;;  %s207_s9 = int_to_ptr.vmem [resolvable:$true] %s206_s9 }
 0x13a   :  { %s368_s0 = scalar_lea.vmem %s197_s7, 128  ;;  %p373_p13 = scmp.lt.s32.totalorder %s197_s7, %s197_s7 }
 0x13b   :  { %p369_p12 = scmp.ne.s32.totalorder %s197_s7, %s368_s0  ;;  %p374_p0 = scmp.lt.s32.totalorder %s368_s0, %s368_s0 }
 0x13d   :  { %p375_p1 = por %p374_p0, %p373_p13 }
 0x13f   :  { %p376_p2 = pnand %p375_p1, %p369_p12 }
 0x1b8   :  { %v151_v12 = vpop.xlane.xlu0 %150 }
 0x1b9   :  { %v152_v13 = vadd.f32 %v151_v12, %v149_v11 }
 0x1bb   :  { %154 = vst.msk [vmem:[#allocation2] sm:$0xff] %vm76_vm3, %v152_v13 }
 0x1bc   :  { %v158_v15 = vpop.xlane.xlu0 %157 }
 0x1bd   :  { %v159_v16 = vadd.f32 %v158_v15, %v155_v14 }
 0x1bf   :  { %160 = vst.msk [vmem:[#allocation3] sm:$0xff] %vm76_vm3, %v159_v16 }
 0x1c2   :  { %v164_v17 = vld [vmem:[#allocation2] sm:$0xff] }
 0x1c3   :  { %v165_v18 = vmul.f32 0.0078125, %v164_v17 }
 0x1c5   :  { %v168_v21 = vmul.f32 %v165_v18, %v165_v18 }
 0x1c6   :  { %v166_v19 = vld [vmem:[#allocation3] sm:$0xff] }
 0x1c7   :  { %v167_v20 = vmul.f32 0.0078125, %v166_v19 }
 0x1c9   :  { %v169_v22 = vsub.f32 %v167_v20, %v168_v21 }
 0x1cb   :  { %v170_v23 = vmax.f32 %v169_v22, 0.0 }
 0x1cd   :  { %v171_v24 = vadd.f32 1e-05, %v170_v23 }
 0x1cf   :  { %256 = vrsqrt.f32 %v171_v24 }
 0x1d9   :  { %v257_v26 = vpop.eup %256 }
 0x1da   :  { %v174_v27 = vmul.f32 %v257_v26, %v173_v25 }
 0x1dc   :  { %175 = vst.msk [vmem:[#allocation13] sm:$0xff] %vm76_vm3, %v174_v27  ;;  %v177_v29 = vmul.f32 %v174_v27, %v165_v18 }
 0x1dd   :  { %379 = shalt.err (!%p376_p2)
}
 0x1de   :  { %s380_s11 = scalar_lea.hbm %s570_s5, 128 }
 0x1df   :  { %p381_p3 = scmp.ne.s32.totalorder %s570_s5, %s380_s11  ;;  %p384_p4 = scmp.lt.u32.totalorder %s380_s11, %s570_s5 }
 0x1e1   :  { %p386_p5 = pnand %p384_p4, %p381_p3 }
 0x1e3   :  { %389 = shalt.err (!%p386_p5)
}
 0x1e4   :  { %199 = dma.vmem_to_hbm [thread:$0]  %s197_s7, 128, %s570_s5, [#allocation14]   ;;  %v178_v30 = vsub.f32 %v176_v28, %v177_v29 }
 0x1e5   :  { %s390_s18 = scalar_lea.vmem %s207_s9, 128  ;;  %p395_p7 = scmp.lt.s32.totalorder %s207_s9, %s207_s9 }
 0x1e6   :  { %179 = vst.msk [vmem:[#allocation15] sm:$0xff] %vm76_vm3, %v178_v30  ;;  %p391_p6 = scmp.ne.s32.totalorder %s207_s9, %s390_s18  ;;  %p396_p8 = scmp.lt.s32.totalorder %s390_s18, %s390_s18 }
 0x1e8   :  { %p397_p9 = por %p396_p8, %p395_p7 }
 0x1ea   :  { %p398_p10 = pnand %p397_p9, %p391_p6 }
 0x1ec   :  { %401 = shalt.err (!%p398_p10)
}
 0x1ed   :  { %s402_s3 = scalar_lea.hbm %s571_s6, 128 }
 0x1ee   :  { %p403_p11 = scmp.ne.s32.totalorder %s571_s6, %s402_s3  ;;  %p406_p12 = scmp.lt.u32.totalorder %s402_s3, %s571_s6 }
 0x1f0   :  { %p408_p13 = pnand %p406_p12, %p403_p11 }
 0x1f2   :  { %411 = shalt.err (!%p408_p13)
}
 0x1f3   :  { %209 = dma.vmem_to_hbm [thread:$0]  %s207_s9, 128, %s571_s6, [#allocation14]  }
 0x1f4   :  { %418 = dma.done.wait [#allocation6], 128  }
 0x1f5   :  { %419 = vsyncadd [#allocation6], 4294967168 }
 0x1f6   :  { %420 = dma.done.wait [#allocation14], 256  }
 0x1f7   :  { %421 = vsyncadd [#allocation14], 4294967040 }
 0x1f8   :  { %219 = vsyncpa [#allocation5], 1 }
 0x1f9   :  { %220 = vsyncpa [#allocation8], 1 }
 0x1fa   :  { %221 = vsyncpa [#allocation11], 1 }
 0x1fb   :  { %222 = vsyncpa [#allocation6], 1 }
 0x1fc   :  { %223 = vsyncpa [#allocation14], 1 }

// kernel: basic_block_forward.8
= control target key start
LH: loop header
LB: loop body
LE: loop exit
PB: predicated region body
PF: predicated region fallthrough
CT: control target
= control target key end

     0   :  { %12 = vsyncpa [#allocation5], 0  ;;  %s591_s0 = inlined_call_operand.hbm [shape: bf16[72,128], index: 0, kind: input, shape index: {}]   ;;  %s592_s1 = inlined_call_operand.hbm [shape: bf16[8,72], index: 1, kind: input, shape index: {}]   ;;  %s593_s2 = inlined_call_operand.hbm [shape: f32[8,1], index: 2, kind: input, shape index: {}]   ;;  %s594_s3 = inlined_call_operand.hbm [shape: f32[8,1], index: 3, kind: input, shape index: {}]   ;;  %s595_s4 = inlined_call_operand.hbm [shape: f32[8,128], index: 4, kind: output, shape index: {0}]   ;;  %s596_s5 = inlined_call_operand.hbm [shape: f32[8,1], index: 5, kind: output, shape index: {1}]   ;;  %s597_s6 = inlined_call_operand.hbm [shape: f32[8,1], index: 6, kind: output, shape index: {2}]  }
   0x1   :  { %13 = vsyncpa [#allocation8], 0 }
   0x2   :  { %14 = vsyncpa [#allocation11], 0 }
   0x3   :  { %15 = vsyncpa [#allocation6], 0 }
   0x4   :  { %16 = vsyncpa [#allocation14], 0  ;;  %s448_s21 = smov [#allocation7]   ;;  %s449_s23 = smov [#allocation4]  }
   0x5   :  { %s35_s22 = sshll.u32 %s448_s21, 4  ;;  %s22_s24 = sshll.u32 %s449_s23, 4  ;;  %s36_s22 = int_to_ptr.vmem [resolvable:$true] %s35_s22  ;;  %s494_s24 = int_to_ptr.vmem [resolvable:$true] %s22_s24 }
   0x6   :  { %s284_s27 = scalar_lea.hbm %s592_s1, 64 }
   0x7   :  { %p285_p0 = scmp.ne.s32.totalorder %s592_s1, %s284_s27  ;;  %p288_p1 = scmp.lt.u32.totalorder %s284_s27, %s592_s1 }
   0x9   :  { %p290_p2 = pnand %p288_p1, %p285_p0 }
   0xb   :  { %293 = shalt.err (!%p290_p2)
}
   0xc   :  { %s294_s8 = scalar_lea.vmem %s36_s22, 64  ;;  %p299_p4 = scmp.lt.s32.totalorder %s36_s22, %s36_s22 }
   0xd   :  { %p295_p3 = scmp.ne.s32.totalorder %s36_s22, %s294_s8  ;;  %p300_p5 = scmp.lt.s32.totalorder %s294_s8, %s294_s8 }
   0xf   :  { %p301_p6 = por %p300_p5, %p299_p4 }
  0x11   :  { %p302_p7 = pnand %p301_p6, %p295_p3 }
  0x13   :  { %305 = shalt.err (!%p302_p7)
}
  0x14   :  { %38 = dma.hbm_to_vmem [thread:$0]  %s592_s1, 64, %s36_s22, [#allocation8]  }
  0x15   :  { %s306_s13 = scalar_lea.hbm %s591_s0, 576 }
  0x16   :  { %p307_p8 = scmp.ne.s32.totalorder %s591_s0, %s306_s13  ;;  %p310_p9 = scmp.lt.u32.totalorder %s306_s13, %s591_s0 }
  0x18   :  { %p312_p10 = pnand %p310_p9, %p307_p8 }
  0x1a   :  { %315 = shalt.err (!%p312_p10)
}
  0x1b   :  { %s316_s18 = scalar_lea.vmem %s494_s24, 576  ;;  %p321_p12 = scmp.lt.s32.totalorder %s494_s24, %s494_s24 }
  0x1c   :  { %p317_p11 = scmp.ne.s32.totalorder %s494_s24, %s316_s18  ;;  %p322_p13 = scmp.lt.s32.totalorder %s316_s18, %s316_s18 }
  0x1e   :  { %p323_p0 = por %p322_p13, %p321_p12 }
  0x20   :  { %p324_p1 = pnand %p323_p0, %p317_p11 }
  0x22   :  { %327 = shalt.err (!%p324_p1)
}
  0x23   :  { %s450_s1 = smov 64   ;;  %s451_s19 = smov 4  }
  0x24   :  { %28 = dma.hbm_to_vmem [thread:$0]  %s591_s0, 576, %s494_s24, [#allocation5], %s450_s1, %s450_s1, %s451_s19  }
  0x25   :  { %s452_s22 = smov [#allocation9]   ;;  %s453_s25 = smov [#allocation10]  }
  0x26   :  { %s45_s23 = sshll.u32 %s452_s22, 4  ;;  %s55_s26 = sshll.u32 %s453_s25, 4  ;;  %s46_s23 = int_to_ptr.vmem [resolvable:$true] %s45_s23  ;;  %s56_s26 = int_to_ptr.vmem [resolvable:$true] %s55_s26 }
  0x27   :  { %s328_s29 = scalar_lea.hbm %s593_s2, 128 }
  0x28   :  { %p329_p2 = scmp.ne.s32.totalorder %s593_s2, %s328_s29  ;;  %p332_p3 = scmp.lt.u32.totalorder %s328_s29, %s593_s2 }
  0x2a   :  { %p334_p4 = pnand %p332_p3, %p329_p2 }
  0x2c   :  { %337 = shalt.err (!%p334_p4)
}
  0x2d   :  { %s338_s0 = scalar_lea.vmem %s46_s23, 128  ;;  %p343_p6 = scmp.lt.s32.totalorder %s46_s23, %s46_s23 }
  0x2e   :  { %p339_p5 = scmp.ne.s32.totalorder %s46_s23, %s338_s0  ;;  %p344_p7 = scmp.lt.s32.totalorder %s338_s0, %s338_s0 }
  0x30   :  { %p345_p8 = por %p344_p7, %p343_p6 }
  0x32   :  { %p346_p9 = pnand %p345_p8, %p339_p5 }
  0x34   :  { %349 = shalt.err (!%p346_p9)
}
  0x35   :  { %48 = dma.hbm_to_vmem [thread:$0]  %s593_s2, 128, %s46_s23, [#allocation8]  }
  0x36   :  { %s350_s13 = scalar_lea.hbm %s594_s3, 128 }
  0x37   :  { %p351_p10 = scmp.ne.s32.totalorder %s594_s3, %s350_s13  ;;  %p354_p11 = scmp.lt.u32.totalorder %s350_s13, %s594_s3 }
  0x39   :  { %p356_p12 = pnand %p354_p11, %p351_p10 }
  0x3b   :  { %359 = shalt.err (!%p356_p12)
}
  0x3c   :  { %s360_s18 = scalar_lea.vmem %s56_s26, 128  ;;  %p365_p0 = scmp.lt.s32.totalorder %s56_s26, %s56_s26 }
  0x3d   :  { %p361_p13 = scmp.ne.s32.totalorder %s56_s26, %s360_s18  ;;  %p366_p1 = scmp.lt.s32.totalorder %s360_s18, %s360_s18 }
  0x3f   :  { %p367_p2 = por %p366_p1, %p365_p0 }
  0x41   :  { %p368_p3 = pnand %p367_p2, %p361_p13 }
  0x43   :  { %371 = shalt.err (!%p368_p3)
}
  0x44   :  { %58 = dma.hbm_to_vmem [thread:$0]  %s594_s3, 128, %s56_s26, [#allocation11]  }
  0x45   :  { %438 = dma.done.wait [#allocation5], 576  }
  0x46   :  { %439 = vsyncadd [#allocation5], 4294966720 }
  0x47   :  { %440 = dma.done.wait [#allocation8], 192  }
  0x48   :  { %441 = vsyncadd [#allocation8], 4294967104 }
  0x49   :  { %442 = dma.done.wait [#allocation11], 128  }
  0x4a   :  { %443 = vsyncadd [#allocation11], 4294967168  ;;  %v454_v0 = vmov 0.0   ;;  %vm455_vm0 = vmmov 0   ;;  %v277_v1 = vld [vmem:[#allocation4] sm:$0xff]   ;;  %v278_v2 = vld [vmem:[#allocation4 + $0x8] sm:$0xff]  }
  0x4b   :  { %252 = vmatprep.subr.bf16.mxu0 %v454_v0  ;;  %262 = vmatprep.mubr.msk.bf16.mxu0 %vm455_vm0, %v454_v0  ;;  %v279_v3 = vld [vmem:[#allocation4 + $0x10] sm:$0xff]   ;;  %v280_v4 = vld [vmem:[#allocation4 + $0x18] sm:$0xff]   ;;  %v281_v5 = vld [vmem:[#allocation4 + $0x20] ss:$0 sps:$4 sm:$0xff]   ;;  %vm120_vm1 = vcmask 1043456   ;;  %vm116_vm2 = vcmask 588800  }
  0x4c   :  { %253 = vmatpush3.bf16.msra.mxu0 %v277_v1  ;;  %v122_v6 = vsel %vm120_vm1, %v281_v5, 0  ;;  %v79_v7 = vld [vmem:[#allocation7] sm:$0xf]  ;;  %vm76_vm3 = vcmask 7168   ;;  %s456_s3 = smov [#allocation12]  }
  0x4d   :  { %254 = vmatprep.subr.bf16.mxu0 %v454_v0  ;;  %77 = vst.msk [vmem:[#allocation2] sm:$0xff] %vm76_vm3, %v454_v0  ;;  %78 = vst.msk [vmem:[#allocation3] sm:$0xff] %vm76_vm3, %v454_v0  ;;  %s202_s19 = sshll.u32 %s456_s3, 4  ;;  %s203_s19 = int_to_ptr.vmem [resolvable:$true] %s202_s19 }
  0x4e   :  { %s372_s20 = scalar_lea.vmem %s203_s19, 128  ;;  %p377_p5 = scmp.lt.s32.totalorder %s203_s19, %s203_s19 }
  0x4f   :  { %p373_p4 = scmp.ne.s32.totalorder %s203_s19, %s372_s20  ;;  %p378_p6 = scmp.lt.s32.totalorder %s372_s20, %s372_s20 }
  0x50   :  { %255 = vmatpush3.bf16.msra.mxu0 %v278_v2 }
  0x51   :  { %256 = vmatprep.subr.bf16.mxu0 %v454_v0  ;;  %p379_p7 = por %p378_p6, %p377_p5 }
  0x53   :  { %p380_p8 = pnand %p379_p7, %p373_p4 }
  0x54   :  { %257 = vmatpush3.bf16.msra.mxu0 %v279_v3 }
  0x55   :  { %258 = vmatprep.subr.bf16.mxu0 %v454_v0 }
  0x58   :  { %259 = vmatpush3.bf16.msra.mxu0 %v280_v4 }
  0x59   :  { %260 = vmatprep.subr.bf16.mxu0 %v454_v0 }
  0x5c   :  { %261 = vmatpush3.bf16.msra.mxu0 %v122_v6 }
  0x5f   :  { %263 = vmatmul.mubr.msk.bf16.vlgmr.msra.gmra.mrb[0].mxu0 %vm116_vm2, %v79_v7 }
 0x132   :  { %v158_v8 = vpop.f32.mrb[0].mxu0 }
 0x133   :  { %164 = vst [vmem:[#allocation12] sm:$0xff] %v158_v8  ;;  %166 = vadd.xlane.f32.xlu0 %v158_v8  ;;  %v264_v9 = vpop.f32.mrb[1].mxu0  ;;  %v172_v12 = vmul.f32 %v158_v8, %v158_v8 }
 0x134   :  { %v161_v10 = vpop.f32.mrb[2].mxu0 }
 0x135   :  { %v265_v11 = vpop.f32.mrb[3].mxu0 }
 0x137   :  { %173 = vadd.xlane.f32.xlu0 %v172_v12 }
 0x138   :  { %383 = shalt.err (!%p380_p8)
}
 0x139   :  { %s384_s23 = scalar_lea.hbm %s595_s4, 128 }
 0x13a   :  { %p385_p9 = scmp.ne.s32.totalorder %s595_s4, %s384_s23  ;;  %p388_p10 = scmp.lt.u32.totalorder %s384_s23, %s595_s4 }
 0x13c   :  { %p390_p11 = pnand %p388_p10, %p385_p9 }
 0x13e   :  { %393 = shalt.err (!%p390_p11)
}
 0x13f   :  { %205 = dma.vmem_to_hbm [thread:$0]  %s203_s19, 128, %s595_s4, [#allocation6]   ;;  %v165_v13 = vld [vmem:[#allocation2] sm:$0xff]  ;;  %v171_v16 = vld [vmem:[#allocation3] sm:$0xff]  ;;  %v189_v27 = vld [vmem:[#allocation9] sm:$0xff] }
 0x140   :  { %s457_s4 = smov [#allocation13]   ;;  %v192_v30 = vld [vmem:[#allocation10] sm:$0xff]  ;;  %s458_s8 = smov [#allocation15]  }
 0x141   :  { %s212_s7 = sshll.u32 %s457_s4, 4  ;;  %s222_s9 = sshll.u32 %s458_s8, 4  ;;  %s213_s7 = int_to_ptr.vmem [resolvable:$true] %s212_s7  ;;  %s223_s9 = int_to_ptr.vmem [resolvable:$true] %s222_s9 }
 0x142   :  { %s394_s0 = scalar_lea.vmem %s213_s7, 128  ;;  %p399_p13 = scmp.lt.s32.totalorder %s213_s7, %s213_s7 }
 0x143   :  { %p395_p12 = scmp.ne.s32.totalorder %s213_s7, %s394_s0  ;;  %p400_p0 = scmp.lt.s32.totalorder %s394_s0, %s394_s0 }
 0x145   :  { %p401_p1 = por %p400_p0, %p399_p13 }
 0x147   :  { %p402_p2 = pnand %p401_p1, %p395_p12 }
 0x1c0   :  { %v167_v14 = vpop.xlane.xlu0 %166 }
 0x1c1   :  { %v168_v15 = vadd.f32 %v167_v14, %v165_v13 }
 0x1c3   :  { %170 = vst.msk [vmem:[#allocation2] sm:$0xff] %vm76_vm3, %v168_v15 }
 0x1c4   :  { %v174_v17 = vpop.xlane.xlu0 %173 }
 0x1c5   :  { %v175_v18 = vadd.f32 %v174_v17, %v171_v16 }
 0x1c7   :  { %176 = vst.msk [vmem:[#allocation3] sm:$0xff] %vm76_vm3, %v175_v18 }
 0x1ca   :  { %v180_v19 = vld [vmem:[#allocation2] sm:$0xff] }
 0x1cb   :  { %v181_v20 = vmul.f32 0.0078125, %v180_v19 }
 0x1cd   :  { %v184_v23 = vmul.f32 %v181_v20, %v181_v20 }
 0x1ce   :  { %v182_v21 = vld [vmem:[#allocation3] sm:$0xff] }
 0x1cf   :  { %v183_v22 = vmul.f32 0.0078125, %v182_v21 }
 0x1d1   :  { %v185_v24 = vsub.f32 %v183_v22, %v184_v23 }
 0x1d3   :  { %v186_v25 = vmax.f32 %v185_v24, 0.0 }
 0x1d5   :  { %v187_v26 = vadd.f32 1e-05, %v186_v25 }
 0x1d7   :  { %282 = vrsqrt.f32 %v187_v26 }
 0x1e1   :  { %v283_v28 = vpop.eup %282 }
 0x1e2   :  { %v190_v29 = vmul.f32 %v283_v28, %v189_v27 }
 0x1e4   :  { %191 = vst.msk [vmem:[#allocation13] sm:$0xff] %vm76_vm3, %v190_v29  ;;  %v193_v31 = vmul.f32 %v190_v29, %v181_v20 }
 0x1e5   :  { %405 = shalt.err (!%p402_p2)
}
 0x1e6   :  { %s406_s11 = scalar_lea.hbm %s596_s5, 128 }
 0x1e7   :  { %p407_p3 = scmp.ne.s32.totalorder %s596_s5, %s406_s11  ;;  %p410_p4 = scmp.lt.u32.totalorder %s406_s11, %s596_s5 }
 0x1e9   :  { %p412_p5 = pnand %p410_p4, %p407_p3 }
 0x1eb   :  { %415 = shalt.err (!%p412_p5)
}
 0x1ec   :  { %215 = dma.vmem_to_hbm [thread:$0]  %s213_s7, 128, %s596_s5, [#allocation14]   ;;  %v194_v32 = vsub.f32 %v192_v30, %v193_v31 }
 0x1ed   :  { %s416_s18 = scalar_lea.vmem %s223_s9, 128  ;;  %p421_p7 = scmp.lt.s32.totalorder %s223_s9, %s223_s9 }
 0x1ee   :  { %195 = vst.msk [vmem:[#allocation15] sm:$0xff] %vm76_vm3, %v194_v32  ;;  %p417_p6 = scmp.ne.s32.totalorder %s223_s9, %s416_s18  ;;  %p422_p8 = scmp.lt.s32.totalorder %s416_s18, %s416_s18 }
 0x1f0   :  { %p423_p9 = por %p422_p8, %p421_p7 }
 0x1f2   :  { %p424_p10 = pnand %p423_p9, %p417_p6 }
 0x1f4   :  { %427 = shalt.err (!%p424_p10)
}
 0x1f5   :  { %s428_s3 = scalar_lea.hbm %s597_s6, 128 }
 0x1f6   :  { %p429_p11 = scmp.ne.s32.totalorder %s597_s6, %s428_s3  ;;  %p432_p12 = scmp.lt.u32.totalorder %s428_s3, %s597_s6 }
 0x1f8   :  { %p434_p13 = pnand %p432_p12, %p429_p11 }
 0x1fa   :  { %437 = shalt.err (!%p434_p13)
}
 0x1fb   :  { %225 = dma.vmem_to_hbm [thread:$0]  %s223_s9, 128, %s597_s6, [#allocation14]  }
 0x1fc   :  { %444 = dma.done.wait [#allocation6], 128  }
 0x1fd   :  { %445 = vsyncadd [#allocation6], 4294967168 }
 0x1fe   :  { %446 = dma.done.wait [#allocation14], 256  }
 0x1ff   :  { %447 = vsyncadd [#allocation14], 4294967040 }
 0x200   :  { %235 = vsyncpa [#allocation5], 1 }
 0x201   :  { %236 = vsyncpa [#allocation8], 1 }
 0x202   :  { %237 = vsyncpa [#allocation11], 1 }
 0x203   :  { %238 = vsyncpa [#allocation6], 1 }
 0x204   :  { %239 = vsyncpa [#allocation14], 1 }

</bundles_post_ra>
